<compile_context>
chip_gen: v7x
topology: tpu7x:2x2x1
jax: 0.10.0
libtpu: 0.0.40
codegen_flags: <defaults>
</compile_context>

<pallas_src>
import math
import functools

import jax
import jax.numpy as jnp
from jax import lax
from jax.experimental import pallas as pl
from jax.experimental.pallas import tpu as pltpu


# ----------------------------------------------------------------------------------
# Fast path: small vocab -> table resident in VMEM, gather via one-hot @ table (MXU).
# ----------------------------------------------------------------------------------
def _resident_table_kernel(ids_ref, table_ref, out_ref, *, scale: float):
    """ids_ref: (TB, 1) int32 | table_ref: (V, D) resident | out_ref: (TB, D)."""
    tb = ids_ref.shape[0]
    v = table_ref.shape[0]
    ids = ids_ref[...]                                              # (TB, 1)
    onehot = ids == lax.broadcasted_iota(jnp.int32, (tb, v), 1)     # (TB, V)
    gathered = jnp.dot(onehot.astype(table_ref.dtype), table_ref[...],
                       preferred_element_type=jnp.float32)          # (TB, D) f32
    if scale != 1.0:
        gathered = gathered * scale                                  # fused into store
    out_ref[...] = gathered.astype(out_ref.dtype)


# ----------------------------------------------------------------------------------
# General path: table stays in HBM, chunked + pipelined per-row DMA gather.
# ----------------------------------------------------------------------------------
def _hbm_gather_kernel(ids_ref, table_hbm, out_ref, row_buf, sems, *,
                       tb: int, cr: int, scale: float):
    """ids_ref  : (N_pad,) int32 in SMEM (scalar prefetch)
       table_hbm: (V, D) table ref left in HBM (memory_space=pl.ANY)
       out_ref  : (TB, D) output block in VMEM
       row_buf  : (2, CR, D) VMEM gather landing buffer (two chunk slots)
       sems     : (2,) DMA semaphores, one per chunk slot
    """
    tile = pl.program_id(0)
    base = pl.multiple_of(tile * tb, tb)
    n_chunks = tb // cr

    def issue_chunk(chunk_idx, slot):
        start = base + chunk_idx * cr
        def issue_row(r, carry):
            tok = ids_ref[start + r]
            pltpu.make_async_copy(table_hbm.at[tok], row_buf.at[slot, r],
                                  sems.at[slot]).start()
            return carry
        # Fully unrolled: SMEM id loads + descriptor builds become visible to the
        # LLO scheduler and co-issue instead of paying per-iteration branch cost.
        lax.fori_loop(0, cr, issue_row, 0, unroll=True)

    issue_chunk(0, 0)                                     # prime the first chunk

    def chunk_body(c, carry):
        slot = c % 2
        # Keep the next chunk's DMAs in flight while we drain/store this one.
        # (Scalar id reads happen before the wait -> no SMEM forwarding stall.)
        @pl.when(c + 1 < n_chunks)
        def _():
            issue_chunk(c + 1, 1 - slot)
        # Single wait for the whole chunk: all `cr` row copies signal sems[slot] in
        # bytes and sum to exactly this (cr, D) descriptor.
        pltpu.make_async_copy(table_hbm.at[pl.ds(0, cr)], row_buf.at[slot],
                              sems.at[slot]).wait()
        rows = row_buf[slot]
        if scale != 1.0:
            rows = rows * scale                            # fused into the store pass
        out_ref[pl.ds(pl.multiple_of(c * cr, cr), cr), :] = rows.astype(out_ref.dtype)
        return carry

    lax.fori_loop(0, n_chunks, chunk_body, 0)


# ----------------------------------------------------------------------------------
# Wrapper
# ----------------------------------------------------------------------------------
def _vmem_limit(est_bytes: int) -> int:
    # Raise the scoped-VMEM limit explicitly (v5e defaults to 16 MiB) while staying
    # well under v7x's 64 MiB physical per-TensorCore VMEM.
    return int(min(40 << 20, max(32 << 20, 2 * est_bytes)))


def _pick_token_tile(n_tokens: int, d: int, itemsize: int, requested) -> int:
    if requested is not None:
        tb = int(requested)
    else:
        budget = 8 * 1024 * 1024                           # double-buffered output pair
        tb = budget // max(1, 2 * d * itemsize)
        tb = int(max(8, min(512, tb)))
    tb = max(8, (tb // 8) * 8)                             # sublane multiple
    tb = max(8, min(tb, 8 * pl.cdiv(n_tokens, 8)))         # don't pad far past N
    # Prefer >= 2 grid tiles so a "parallel" grid can split across v7x's two TCs.
    if n_tokens > 8 and pl.cdiv(n_tokens, tb) < 2:
        tb = max(8, 8 * pl.cdiv(pl.cdiv(n_tokens, 2), 8))
    return tb


def embeddings_forward(source: jax.Array, table: jax.Array, *,
                       scale: bool = True, token_tile=None) -> jax.Array:
    """Pallas equivalent of Embeddings.forward.

    source: integer token ids, any shape (e.g. (B, S))
    table : (V, D) embedding table
    returns: source.shape + (D,)
    """
    lead_shape = tuple(source.shape)
    n_tokens = int(math.prod(lead_shape)) if lead_shape else 1
    v, d = table.shape
    itemsize = jnp.dtype(table.dtype).itemsize

    tb = _pick_token_tile(n_tokens, d, itemsize, token_tile)
    num_tiles = pl.cdiv(n_tokens, tb)
    n_pad = num_tiles * tb

    ids = source.reshape(n_tokens).astype(jnp.int32)
    # nn.Embedding raises on out-of-range ids; we clamp so the gather stays in bounds.
    # TODO(synk): surface out-of-range ids instead of silently clamping.
    ids = jnp.clip(ids, 0, v - 1)
    if n_pad != n_tokens:
        ids = jnp.pad(ids, (0, n_pad - n_tokens))          # pad rows sliced off below

    scale_val = float(math.sqrt(d)) if scale else 1.0
    out_shape = jax.ShapeDtypeStruct((n_pad, d), table.dtype)

    table_bytes = v * d * itemsize
    use_resident = (v <= 2048 and table_bytes <= (4 << 20)) or v < 8

    if use_resident:
        est = 2 * table_bytes + 2 * tb * d * itemsize + tb * v * 4 + tb * d * 4
        kernel = functools.partial(_resident_table_kernel, scale=scale_val)
        out_flat = pl.pallas_call(
            kernel,
            out_shape=out_shape,
            grid_spec=pltpu.PrefetchScalarGridSpec(
                num_scalar_prefetch=0,
                grid=(num_tiles,),
                in_specs=[
                    pl.BlockSpec((tb, 1), lambda i: (i, 0)),    # token ids per tile
                    pl.BlockSpec((v, d), lambda i: (0, 0)),     # whole table, resident
                ],
                out_specs=pl.BlockSpec((tb, d), lambda i: (i, 0)),
            ),
            compiler_params=pltpu.CompilerParams(
                dimension_semantics=("parallel",),
                vmem_limit_bytes=_vmem_limit(est),
            ),
        )(ids.reshape(n_pad, 1), table)
    else:
        # Chunk rows: largest of {64,32,16,8} that divides TB (and is <= V).
        cr = 8
        for cand in (64, 32, 16):
            if tb % cand == 0 and cand <= v:
                cr = cand
                break
        est = 2 * tb * d * itemsize + 2 * cr * d * itemsize + tb * d * 4
        kernel = functools.partial(_hbm_gather_kernel, tb=tb, cr=cr, scale=scale_val)
        out_flat = pl.pallas_call(
            kernel,
            out_shape=out_shape,
            grid_spec=pltpu.PrefetchScalarGridSpec(
                num_scalar_prefetch=1,                          # ids -> SMEM
                grid=(num_tiles,),
                in_specs=[pl.BlockSpec(memory_space=pl.ANY)],   # table stays in HBM
                out_specs=pl.BlockSpec((tb, d), lambda i, *_: (i, 0)),
                scratch_shapes=[
                    pltpu.VMEM((2, cr, d), table.dtype),        # 2 chunk landing slots
                    pltpu.SemaphoreType.DMA((2,)),              # per-slot DMA sems
                ],
            ),
            compiler_params=pltpu.CompilerParams(
                dimension_semantics=("parallel",),
                vmem_limit_bytes=_vmem_limit(est),
            ),
        )(ids, table)

    return out_flat[:n_tokens].reshape(*lead_shape, d)


def make_embedding_table(key, vocab_size: int, embedding_dim: int,
                         padding_index: int) -> jax.Array:
    # nn.Embedding default init: N(0, 1), with the padding row zeroed.
    table = jax.random.normal(key, (vocab_size, embedding_dim), dtype=jnp.float32)
    return table.at[padding_index].set(0.0)


if __name__ == "__main__":
    key = jax.random.PRNGKey(0)
    k_tab1, k_ids1, k_tab2, k_ids2 = jax.random.split(key, 4)
    padding_index = 1

    # --- config 1: small vocab -> resident-table (one-hot @ table MXU) fast path ---
    embedding_dim, vocab_size = 128, 512
    batch, seq = 4, 64
    table1 = make_embedding_table(k_tab1, vocab_size, embedding_dim, padding_index)
    src1 = jax.random.randint(k_ids1, (batch, seq), 0, vocab_size, dtype=jnp.int32)
    out1 = jax.block_until_ready(embeddings_forward(src1, table1, scale=True))
    ref1 = jnp.take(table1, src1, axis=0) * math.sqrt(embedding_dim)
    assert out1.shape == (batch, seq, embedding_dim)
    assert jnp.allclose(out1, ref1, atol=1e-5, rtol=1e-5)

    # --- config 2: larger vocab -> HBM-resident table, chunked DMA row gather ---
    embedding_dim2, vocab_size2 = 128, 4096
    batch2, seq2 = 2, 128
    table2 = make_embedding_table(k_tab2, vocab_size2, embedding_dim2, padding_index)
    src2 = jax.random.randint(k_ids2, (batch2, seq2), 0, vocab_size2, dtype=jnp.int32)
    out2 = jax.block_until_ready(embeddings_forward(src2, table2, scale=True))
    ref2 = jnp.take(table2, src2, axis=0) * math.sqrt(embedding_dim2)
    assert out2.shape == (batch2, seq2, embedding_dim2)
    assert jnp.allclose(out2, ref2, atol=1e-5, rtol=1e-5)

    # --- scale=False branch of the module ---
    out3 = jax.block_until_ready(embeddings_forward(src1, table1, scale=False))
    assert jnp.allclose(out3, jnp.take(table1, src1, axis=0), atol=1e-5, rtol=1e-5)

    print("KERNEL_OK")
</pallas_src>

<mosaic_0001>
module attributes {stable_mosaic.version = 11 : i64} {
  func.func @_resident_table_kernel(%arg0: i32, %arg1: memref<128x1xi32, #tpu.memory_space<vmem>>, %arg2: memref<512x128xf32, #tpu.memory_space<vmem>>, %arg3: memref<128x128xf32, #tpu.memory_space<vmem>>) attributes {dimension_semantics = [#tpu.dimension_semantics<parallel>], iteration_bounds = array<i64: 2>, scalar_prefetch = 0 : i64, scratch_operands = 0 : i64, tpu.core_type = #tpu.core_type<tc>, window_params = [{transform_indices = @transform_0, window_bounds = array<i64: 128, 1>}, {pipeline_mode = #tpu.pipeline_mode<synchronous>, transform_indices = @transform_1, window_bounds = array<i64: 512, 128>}, {transform_indices = @transform_2, window_bounds = array<i64: 128, 128>}]} {
    %c0 = arith.constant 0 : index
    %c0_0 = arith.constant 0 : index
    %0 = vector.load %arg1[%c0, %c0_0] : memref<128x1xi32, #tpu.memory_space<vmem>>, vector<128x1xi32>
    %1 = tpu.iota {dimensions = array<i32: 1>} : vector<128x512xi32>
    %2 = vector.broadcast %0 : vector<128x1xi32> to vector<128x512xi32>
    %3 = arith.cmpi eq, %2, %1 : vector<128x512xi32>
    %4 = arith.extui %3 : vector<128x512xi1> to vector<128x512xi32>
    %5 = arith.sitofp %4 : vector<128x512xi32> to vector<128x512xf32>
    %c0_1 = arith.constant 0 : index
    %c0_2 = arith.constant 0 : index
    %6 = vector.load %arg2[%c0_1, %c0_2] : memref<512x128xf32, #tpu.memory_space<vmem>>, vector<512x128xf32>
    %cst = arith.constant dense<0.000000e+00> : vector<128x128xf32>
    %7 = tpu.matmul %5, %6, %cst {dimension_numbers = #tpu.dot_dimension_numbers<[1], [0], [0], [1], [0, 0, 1, 1], [], []>} : vector<128x512xf32>, vector<512x128xf32>, vector<128x128xf32> -> vector<128x128xf32>
    %cst_3 = arith.constant 11.3137083 : f32
    %8 = vector.broadcast %cst_3 : f32 to vector<128x128xf32>
    %9 = arith.mulf %7, %8 : vector<128x128xf32>
    %c0_4 = arith.constant 0 : index
    %c0_5 = arith.constant 0 : index
    %10 = vector.load %arg3[%c0_4, %c0_5] : memref<128x128xf32, #tpu.memory_space<vmem>>, vector<128x128xf32>
    tpu.vector_store %arg3[%c0_4, %c0_5], %9 {strides = array<i32>} : memref<128x128xf32, #tpu.memory_space<vmem>>, vector<128x128xf32>,
    return
  }
  func.func @transform_0(%arg0: i32) -> (i32, i32) {
    %c0_i32 = arith.constant 0 : i32
    %c0_i32_0 = arith.constant 0 : i32
    return %arg0, %c0_i32 : i32, i32
  }
  func.func @transform_1(%arg0: i32) -> (i32, i32) {
    %c0_i32 = arith.constant 0 : i32
    %c0_i32_0 = arith.constant 0 : i32
    %c0_i32_1 = arith.constant 0 : i32
    return %c0_i32, %c0_i32_0 : i32, i32
  }
  func.func @transform_2(%arg0: i32) -> (i32, i32) {
    %c0_i32 = arith.constant 0 : i32
    %c0_i32_0 = arith.constant 0 : i32
    return %arg0, %c0_i32 : i32, i32
  }
}

</mosaic_0001>

<bundles_post_ra>
// kernel: tpu_custom_call.1
= control target key start
LH: loop header
LB: loop body
LE: loop exit
PB: predicated region body
PF: predicated region fallthrough
CT: control target
= control target key end

     0   :  { %7 = vsyncpa [#allocation3], 0  ;;  %s1756_s0 = inlined_call_operand.vmem [shape: s32[256,1], index: 0, kind: input, shape index: {}]   ;;  %s1757_s1 = inlined_call_operand.hbm [shape: f32[512,128], index: 1, kind: input, shape index: {}]   ;;  %s1758_s2 = inlined_call_operand.hbm [shape: f32[256,128], index: 2, kind: output, shape index: {}]  }
   0x1   :  { %8 = vsyncpa [#allocation4], 0 }
   0x2   :  { %10 = vsyncpa [#allocation4 + $0x1], 0  ;;  %s1439_s9 = smov 0   ;;  %s1441_s10 = smov 0  }
   0x3   :  { %s1443_s11 = smov 0   ;;  %s1445_s12 = smov 0  }
   0x4 LB: > { %s1460_s13 = sadd.s32 4294967295, %s1414_s12   ;;  %s895_s14 = sadd.s32 4294967294, %s1414_s12   ;;  %s1414_s12 = sphi %s1445_s12, %s1774_s12   ;;  %s1410_s11 = sphi %s1443_s11, %s1773_s11   ;;  %s1406_s10 = sphi %s1441_s10, %s1772_s10   ;;  %s1402_s9 = sphi %s1439_s9, %s1771_s9  }
   0x5   : > { %s1464_s15 = sadd.s32 1, %s1414_s12   ;;  %s70_s16 = sadd.s32 1, %s1410_s11 }
   0x6   : > { %s67_s17 = ssub.s32 %s1414_s12, %s1464_s15  ;;  %p80_p0 = scmp.ne.s32.totalorder %s1410_s11, %s1406_s10 }
   0x7   : > { %p68_p1 = scmp.eq.s32.totalorder %s67_s17, 0  ;;  %p81_p2 = scmp.eq.s32.totalorder %s1460_s13, 1 }
   0x8   : > { %p86_p3 = scmp.ne.s32.totalorder %s1406_s10, %s1402_s9  ;;  %p87_p4 = scmp.eq.s32.totalorder %s895_s14, 1 }
   0x9   : > { %s1475_s18 = scalar_select %p68_p1, %s1410_s11, %s70_s16  }
   0xa   : > { %p1477_p5 = por %p81_p2, %p80_p0  ;;  %p1481_p6 = por %p87_p4, %p86_p3 }
   0xb   : > { %p896_p7 = scmp.ge.s32.totalorder %s1414_s12, 1  ;;  %p94_p8 = scmp.lt.s32.totalorder %s1414_s12, 3 }
   0xc   : > { %s1762_s19 = scalar_select %p1477_p5, 1, 0 }
   0xd   : > { %s1763_s20 = scalar_select %p1481_p6, 1, 0 }
   0xe   : > { %p1759_p9 = scmp.eq.s32.totalorder %s1460_s13, 0  ;;  %p1488_p10 = pnand %p896_p7, %p94_p8 }
   0xf   : > { %s1416_s22 = smov [#allocation2]   ;;  %s1320_s27 = scalar_lea.hbm %s1757_s1, 8192 }
  0x10   : > { %s1764_s21 = scalar_select %p1488_p10, 1, 0 }
  0x11   : > { %s106_s23 = sshll.u32 %s1416_s22, 4  ;;  %p1268_p11 = pneg %p1488_p10  ;;  %s107_s23 = int_to_ptr.vmem [resolvable:$true] %s106_s23 }
  0x12   : > { %p1321_p13 = scmp.ne.s32.totalorder %s1757_s1, %s1320_s27  ;;  %p1327_p3 = scmp.lt.u32.totalorder %s1320_s27, %s1757_s1 }
  0x13   : > { %p1496_p12 = pnand %p1759_p9, %p1268_p11 }
  0x15   : > { %p1322_p0 = pneg %p1496_p12 }
  0x17   : > { %p1323_p1 = pnand %p1322_p0, %p1321_p13 }
  0x19   : > { %p1324_p2 = pneg %p1323_p1 }
  0x1b   : > { %p1329_p4 = pnand %p1327_p3, %p1324_p2 }
  0x1d   : > { %1332 = shalt.err (!%p1329_p4)
}
  0x1e   : > { %s1333_s4 = scalar_lea.vmem %s107_s23, 8192  ;;  %p1341_p9 = scmp.lt.s32.totalorder %s107_s23, %s107_s23 }
  0x1f   : > { %p1334_p7 = scmp.ne.s32.totalorder %s107_s23, %s1333_s4  ;;  %p1342_p6 = scmp.lt.s32.totalorder %s1333_s4, %s1333_s4 }
  0x21   : > { %p1336_p8 = pnand %p1334_p7, %p1322_p0  ;;  %p1343_p5 = por %p1342_p6, %p1341_p9 }
  0x23   : > { %p1337_p11 = pneg %p1336_p8 }
  0x25   : > { %p1344_p10 = pnand %p1343_p5, %p1337_p11 }
  0x27   : > { %1347 = shalt.err (!%p1344_p10)
}
  0x28   : > { %s1417_s5 = smov 128   ;;  %s1418_s6 = smov 8  }
  0x29   : > { %1271 = dma.hbm_to_vmem [thread:$0]  (!%p1496_p12), %s1757_s1, 8192, %s107_s23, [#allocation3], %s1417_s5, %s1417_s5, %s1418_s6  }
  0x2a   : > { %p1766_p13 = scmp.ne.s32.totalorder %s1764_s21, 0 }
  0x2b   : > { %p1767_p1 = scmp.eq.s32.totalorder (!%p1766_p13), %s1460_s13, 0 }
  0x2c   : > { %131 = sbr.rel (%p1766_p13) target bundleno = 483 (0x1e3), region = 28 }
  0x33   : > { %1393 = dma.done.wait (%p1767_p1), [#allocation3], 8192   ;;  %p1768_p0 = pmov %p1767_p1 }
  0x34   : > { %s902_s14 = sshll.u32 %s1460_s13, 4  ;;  %v1419_v0 = vmov 0   ;;  %v437_v7 = vld [vmem:[#allocation2 + $0x80] sm:$0xff]  ;;  %v438_v8 = vld [vmem:[#allocation2 + $0x88] sm:$0xff]  ;;  %v439_v21 = vld [vmem:[#allocation2 + $0x90] sm:$0xff]  ;;  %s150_s21 = sand.u32 1, %s1406_s10  }
  0x35   : > { %1395 = vsyncadd (%p1768_p0), [#allocation3], 4294959104  ;;  %1319 = vset.pattern.permute.xlu1 %v1419_v0  ;;  %1318 = vset.pattern.permute.xlu0 %v1419_v0  ;;  %p154_p5 = scmp.lt.s32.totalorder %s902_s14, 31  ;;  %v1198_v9 = vpack.c.bf16 %v438_v8, %v437_v7  ;;  %v469_v10 = vld [vmem:[#allocation2 + $0x180] sm:$0xff]  ;;  %v470_v11 = vld [vmem:[#allocation2 + $0x188] sm:$0xff]  ;;  %s901_s24 = sshll.u32 %s150_s21, 7 }
  0x36   : > { %v421_v12 = vld [vmem:[#allocation2] sm:$0xff]  ;;  %v1230_v13 = vpack.c.bf16 %v470_v11, %v469_v10  ;;  %v422_v14 = vld [vmem:[#allocation2 + $0x8] sm:$0xff]  ;;  %v440_v22 = vld [vmem:[#allocation2 + $0x98] sm:$0xff]  ;;  %s1686_s25 = scalar_lea.vmem [#allocation5], %s901_s24  ;;  %s1037_s26 = sshll.u32 %s1460_s13, 11 }
  0x37   : > { %s1776_s14 = smov (!%p154_p5, %s902_s14), 31  ;;  %v453_v15 = vld [vmem:[#allocation2 + $0x100] sm:$0xff]  ;;  %v454_v16 = vld [vmem:[#allocation2 + $0x108] sm:$0xff]  ;;  %1199 = vmatprep.subr.bf16.mxu0 %v1198_v9  ;;  %v1200_v19 = vpack.c.bf16 %v422_v14, %v421_v12  ;;  %v471_v23 = vld [vmem:[#allocation2 + $0x190] sm:$0xff]  ;;  %v1202_v24 = vpack.c.bf16 %v440_v22, %v439_v21  ;;  %s821_s27 = sshll.u32 %s1686_s25, 4  ;;  %s1710_s27 = int_to_ptr.vmem [resolvable:$true] %s821_s27 }
  0x38   : > { %s903_s16 = sshll.u32 %s1776_s14, 3  ;;  %v1232_v20 = vpack.c.bf16 %v454_v16, %v453_v15  ;;  %v472_v25 = vld [vmem:[#allocation2 + $0x198] sm:$0xff]  ;;  %v423_v26 = vld [vmem:[#allocation2 + $0x10] sm:$0xff]  ;;  %1231 = vmatprep.subr.bf16.mxu1 %v1230_v13  ;;  %v441_v32 = vld [vmem:[#allocation2 + $0xa0] sm:$0xff]  ;;  %s1708_s30 = scalar_lea.hbm %s1758_s2, %s1037_s26 }
  0x39   : > { %s1526_s23 = scalar_lea.vmem %s1756_s0, %s903_s16  ;;  %v424_v27 = vld [vmem:[#allocation2 + $0x18] sm:$0xff]  ;;  %1201 = vmatpush3.bf16.msra.mxu0 %v1200_v19  ;;  %v1234_v28 = vpack.c.bf16 %v472_v25, %v471_v23  ;;  %v455_v30 = vld [vmem:[#allocation2 + $0x110] sm:$0xff]  ;;  %v442_v34 = vld [vmem:[#allocation2 + $0xa8] sm:$0xff]  ;;  %s1715_s3 = scalar_lea.sflag [#allocation4], %s150_s21 }
  0x3a   : > { %v162_v1 = vld [vmem:[%s1526_s23 + $0x10] sm:$0xff]  ;;  %v160_v2 = vld [vmem:[%s1526_s23] sm:$0xff]  ;;  %v163_v3 = vld [vmem:[%s1526_s23 + $0x18] sm:$0xff]  ;;  %v1204_v29 = vpack.c.bf16 %v424_v27, %v423_v26  ;;  %1233 = vmatpush3.bf16.msra.mxu1 %v1232_v20  ;;  %1203 = vmatprep.subr.bf16.mxu0 %v1202_v24  ;;  %v1206_v38 = vpack.c.bf16 %v442_v34, %v441_v32  ;;  %s1348_s4 = scalar_lea.vmem %s1710_s27, 2048  ;;  %p1769_p9 = scmp.ne.s32.totalorder %s1762_s19, 0 }
  0x3b   : > { %188 = vperm.xlu1 %1319, %v162_v1   ;;  %182 = vperm.xlu0 %1318, %v160_v2   ;;  %v161_v4 = vld [vmem:[%s1526_s23 + $0x8] sm:$0xff]  ;;  %v164_v6 = vld [vmem:[%s1526_s23 + $0x20] sm:$0xff]  ;;  %v167_v17 = vld [vmem:[%s1526_s23 + $0x38] sm:$0xff]  ;;  %p1349_p6 = scmp.ne.s32.totalorder %s1710_s27, %s1348_s4  ;;  %s1421_s13 = smov [#allocation5]  }
  0x3c   : > { %v165_v5 = vld [vmem:[%s1526_s23 + $0x28] sm:$0xff]  ;;  %v166_v18 = vld [vmem:[%s1526_s23 + $0x30] sm:$0xff]  ;;  %v456_v31 = vld [vmem:[#allocation2 + $0x118] sm:$0xff]  ;;  %1235 = vmatprep.subr.bf16.mxu1 %v1234_v28  ;;  %s1352_s5 = sshll.u32 %s1421_s13, 4  ;;  %s1353_s5 = int_to_ptr.vmem [resolvable:$false] %s1352_s5 }
  0x3d   : > { %v1236_v33 = vpack.c.bf16 %v456_v31, %v455_v30  ;;  %v473_v35 = vld [vmem:[#allocation2 + $0x1a0] sm:$0xff]  ;;  %v474_v36 = vld [vmem:[#allocation2 + $0x1a8] sm:$0xff]  ;;  %v443_v44 = vld [vmem:[#allocation2 + $0xb0] sm:$0xff]  ;;  %1205 = vmatpush3.bf16.msra.mxu0 %v1204_v29  ;;  %p1350_p10 = pnand %p1349_p6, %p1769_p9  ;;  %s1354_s6 = scalar_lea.vmem %s1353_s5, 4096 }
  0x3e   : > { %v169_v37 = vld [vmem:[%s1526_s23 + $0x48] sm:$0xff]  ;;  %v1238_v39 = vpack.c.bf16 %v474_v36, %v473_v35  ;;  %v425_v40 = vld [vmem:[#allocation2 + $0x20] sm:$0xff]  ;;  %v444_v45 = vld [vmem:[#allocation2 + $0xb8] sm:$0xff]  ;;  %1207 = vmatprep.subr.bf16.mxu0 %v1206_v38  ;;  %p1355_p2 = scmp.lt.s32.totalorder %s1710_s27, %s1353_s5  ;;  %p1356_p3 = scmp.lt.s32.totalorder %s1354_s6, %s1348_s4 }
  0x3f   : > { %191 = vperm.xlu1 %1319, %v163_v3   ;;  %185 = vperm.xlu0 %1318, %v161_v4   ;;  %v426_v41 = vld [vmem:[#allocation2 + $0x28] sm:$0xff]  ;;  %v457_v42 = vld [vmem:[#allocation2 + $0x120] sm:$0xff]  ;;  %v475_v48 = vld [vmem:[#allocation2 + $0x1b0] sm:$0xff]  ;;  %v1210_v51 = vpack.c.bf16 %v444_v45, %v443_v44  ;;  %p1351_p12 = pneg %p1350_p10 }
  0x40   : > { %v458_v43 = vld [vmem:[#allocation2 + $0x128] sm:$0xff]  ;;  %v168_v46 = vld [vmem:[%s1526_s23 + $0x40] sm:$0xff]  ;;  %v1208_v47 = vpack.c.bf16 %v426_v41, %v425_v40  ;;  %v476_v49 = vld [vmem:[#allocation2 + $0x1b8] sm:$0xff]  ;;  %1237 = vmatpush3.bf16.msra.mxu1 %v1236_v33  ;;  %p1357_p4 = por %p1356_p3, %p1355_p2 }
  0x41   : > { %v1240_v50 = vpack.c.bf16 %v458_v43, %v457_v42  ;;  %v427_v52 = vld [vmem:[#allocation2 + $0x30] sm:$0xff]  ;;  %v428_v53 = vld [vmem:[#allocation2 + $0x38] sm:$0xff]  ;;  %1239 = vmatprep.subr.bf16.mxu1 %v1238_v39  ;;  %v1242_v55 = vpack.c.bf16 %v476_v49, %v475_v48  ;;  %v445_v57 = vld [vmem:[#allocation2 + $0xc0] sm:$0xff]  ;;  %v176_v49 = vlaneseq }
  0x42   : > { %v459_v54 = vld [vmem:[#allocation2 + $0x130] sm:$0xff]  ;;  %v460_v56 = vld [vmem:[#allocation2 + $0x138] sm:$0xff]  ;;  %v446_v58 = vld [vmem:[#allocation2 + $0xc8] sm:$0xff]  ;;  %1209 = vmatpush3.bf16.msra.mxu0 %v1208_v47  ;;  %v1212_v63 = vpack.c.bf16 %v428_v53, %v427_v52  ;;  %p1358_p7 = pnand %p1357_p4, %p1351_p12 }
  0x43   : > { %197 = vperm.xlu1 %1319, %v165_v5   ;;  %194 = vperm.xlu0 %1318, %v164_v6   ;;  %v477_v59 = vld [vmem:[#allocation2 + $0x1c0] sm:$0xff]  ;;  %v478_v60 = vld [vmem:[#allocation2 + $0x1c8] sm:$0xff]  ;;  %v171_v61 = vld [vmem:[%s1526_s23 + $0x58] sm:$0xff]  ;;  %v1244_v0 = vpack.c.bf16 %v460_v56, %v459_v54  ;;  %v1214_v1 = vpack.c.bf16 %v446_v58, %v445_v57 }
  0x44   : > { %v170_v62 = vld [vmem:[%s1526_s23 + $0x50] sm:$0xff]  ;;  %1241 = vmatpush3.bf16.msra.mxu1 %v1240_v50  ;;  %1211 = vmatprep.subr.bf16.mxu0 %v1210_v51  ;;  %v429_v2 = vld [vmem:[#allocation2 + $0x40] sm:$0xff]  ;;  %v430_v3 = vld [vmem:[#allocation2 + $0x48] sm:$0xff]  ;;  %v1246_v5 = vpack.c.bf16 %v478_v60, %v477_v59  ;;  %v1544_v50 = vand.u32 127, %v176_v49 }
  0x45   : > { %v461_v4 = vld [vmem:[#allocation2 + $0x140] sm:$0xff]  ;;  %1243 = vmatprep.subr.bf16.mxu1 %v1242_v55  ;;  %v462_v6 = vld [vmem:[#allocation2 + $0x148] sm:$0xff]  ;;  %v447_v7 = vld [vmem:[#allocation2 + $0xd0] sm:$0xff]  ;;  %v1216_v13 = vpack.c.bf16 %v430_v3, %v429_v2  ;;  %v1420_v55 = vmov 1.0  }
  0x46   : > { %v448_v8 = vld [vmem:[#allocation2 + $0xd8] sm:$0xff]  ;;  %v479_v9 = vld [vmem:[#allocation2 + $0x1d0] sm:$0xff]  ;;  %v173_v11 = vld [vmem:[%s1526_s23 + $0x68] sm:$0xff]  ;;  %1213 = vmatpush3.bf16.msra.mxu0 %v1212_v63  ;;  %v1248_v14 = vpack.c.bf16 %v462_v6, %v461_v4  ;;  %v1547_v51 = vadd.s32 128, %v1544_v50  ;;  %v1550_v52 = vadd.s32 384, %v1544_v50  ;;  %v1553_v53 = vadd.s32 256, %v1544_v50 }
  0x47   : > { %203 = vperm.xlu1 %1319, %v167_v17   ;;  %200 = vperm.xlu0 %1318, %v166_v18   ;;  %v480_v10 = vld [vmem:[#allocation2 + $0x1d8] sm:$0xff]  ;;  %v172_v12 = vld [vmem:[%s1526_s23 + $0x60] sm:$0xff]  ;;  %v1218_v15 = vpack.c.bf16 %v448_v8, %v447_v7  ;;  %v431_v16 = vld [vmem:[#allocation2 + $0x50] sm:$0xff] }
  0x48   : > { %1245 = vmatpush3.bf16.msra.mxu1 %v1244_v0  ;;  %1215 = vmatprep.subr.bf16.mxu0 %v1214_v1  ;;  %v432_v17 = vld [vmem:[#allocation2 + $0x58] sm:$0xff]  ;;  %v463_v18 = vld [vmem:[#allocation2 + $0x150] sm:$0xff]  ;;  %v1250_v19 = vpack.c.bf16 %v480_v10, %v479_v9  ;;  %v449_v21 = vld [vmem:[#allocation2 + $0xe0] sm:$0xff] }
  0x49   : > { %1247 = vmatprep.subr.bf16.mxu1 %v1246_v5  ;;  %v464_v20 = vld [vmem:[#allocation2 + $0x158] sm:$0xff]  ;;  %v450_v22 = vld [vmem:[#allocation2 + $0xe8] sm:$0xff]  ;;  %v481_v23 = vld [vmem:[#allocation2 + $0x1e0] sm:$0xff]  ;;  %v1220_v27 = vpack.c.bf16 %v432_v17, %v431_v16 }
  0x4a   : > { %v482_v24 = vld [vmem:[#allocation2 + $0x1e8] sm:$0xff]  ;;  %v175_v25 = vld [vmem:[%s1526_s23 + $0x78] sm:$0xff]  ;;  %v174_v26 = vld [vmem:[%s1526_s23 + $0x70] sm:$0xff]  ;;  %1217 = vmatpush3.bf16.msra.mxu0 %v1216_v13  ;;  %v1252_v28 = vpack.c.bf16 %v464_v20, %v463_v18  ;;  %v1222_v29 = vpack.c.bf16 %v450_v22, %v449_v21 }
  0x4b   : > { %209 = vperm.xlu1 %1319, %v169_v37   ;;  %206 = vperm.xlu0 %1318, %v168_v46   ;;  %v433_v30 = vld [vmem:[#allocation2 + $0x60] sm:$0xff]  ;;  %v434_v31 = vld [vmem:[#allocation2 + $0x68] sm:$0xff]  ;;  %v1254_v33 = vpack.c.bf16 %v482_v24, %v481_v23  ;;  %v451_v35 = vld [vmem:[#allocation2 + $0xf0] sm:$0xff] }
  0x4c   : > { %1249 = vmatpush3.bf16.msra.mxu1 %v1248_v14  ;;  %1219 = vmatprep.subr.bf16.mxu0 %v1218_v15  ;;  %v465_v32 = vld [vmem:[#allocation2 + $0x160] sm:$0xff]  ;;  %v466_v34 = vld [vmem:[#allocation2 + $0x168] sm:$0xff]  ;;  %v452_v36 = vld [vmem:[#allocation2 + $0xf8] sm:$0xff]  ;;  %v1224_v39 = vpack.c.bf16 %v434_v31, %v433_v30 }
  0x4d   : > { %1251 = vmatprep.subr.bf16.mxu1 %v1250_v19  ;;  %v483_v37 = vld [vmem:[#allocation2 + $0x1f0] sm:$0xff]  ;;  %v484_v38 = vld [vmem:[#allocation2 + $0x1f8] sm:$0xff]  ;;  %v1256_v40 = vpack.c.bf16 %v466_v34, %v465_v32  ;;  %v1226_v41 = vpack.c.bf16 %v452_v36, %v451_v35 }
  0x4e   : > { %1221 = vmatpush3.bf16.msra.mxu0 %v1220_v27  ;;  %v435_v42 = vld [vmem:[#allocation2 + $0x70] sm:$0xff]  ;;  %v436_v43 = vld [vmem:[#allocation2 + $0x78] sm:$0xff]  ;;  %v1258_v44 = vpack.c.bf16 %v484_v38, %v483_v37 }
  0x4f   : > { %215 = vperm.xlu1 %1319, %v171_v61   ;;  %212 = vperm.xlu0 %1318, %v170_v62   ;;  %v467_v45 = vld [vmem:[#allocation2 + $0x170] sm:$0xff]  ;;  %v468_v46 = vld [vmem:[#allocation2 + $0x178] sm:$0xff]  ;;  %v1228_v47 = vpack.c.bf16 %v436_v43, %v435_v42 }
  0x50   : > { %1253 = vmatpush3.bf16.msra.mxu1 %v1252_v28  ;;  %1223 = vmatprep.subr.bf16.mxu0 %v1222_v29  ;;  %v1260_v48 = vpack.c.bf16 %v468_v46, %v467_v45 }
  0x51   : > { %1255 = vmatprep.subr.bf16.mxu1 %v1254_v33 }
  0x52   : > { %1225 = vmatpush3.bf16.msra.mxu0 %v1224_v39 }
  0x53   : > { %221 = vperm.xlu1 %1319, %v173_v11   ;;  %218 = vperm.xlu0 %1318, %v172_v12  }
  0x54   : > { %1257 = vmatpush3.bf16.msra.mxu1 %v1256_v40  ;;  %1227 = vmatprep.subr.bf16.mxu0 %v1226_v41 }
  0x55   : > { %1259 = vmatprep.subr.bf16.mxu1 %v1258_v44 }
  0x56   : > { %1229 = vmatpush3.bf16.msra.mxu0 %v1228_v47 }
  0x57   : > { %227 = vperm.xlu1 %1319, %v175_v25   ;;  %224 = vperm.xlu0 %1318, %v174_v26  }
  0x58   : > { %1261 = vmatpush3.bf16.msra.mxu1 %v1260_v48 }
  0xba   : > { %v183_v54 = vpop.permute.xlu0 %182  ;;  %v189_v56 = vpop.permute.xlu1 %188 }
  0xbb   : > { %vm230_vm0 = vcmp.eq.s32.totalorder %v183_v54, %v1547_v51  ;;  %vm232_vm1 = vcmp.eq.s32.totalorder %v183_v54, %v1550_v52  ;;  %vm229_vm2 = vcmp.eq.s32.totalorder %v183_v54, %v1544_v50  ;;  %vm231_vm3 = vcmp.eq.s32.totalorder %v183_v54, %v1553_v53 }
  0xbc   : > { %968 = vmatprep.mubr.msk.f32.mxu0 %vm230_vm0, %v1420_v55  ;;  %1000 = vmatprep.mubr.msk.f32.mxu1 %vm232_vm1, %v1420_v55  ;;  %vm238_vm4 = vcmp.eq.s32.totalorder %v189_v56, %v1547_v51  ;;  %vm240_vm5 = vcmp.eq.s32.totalorder %v189_v56, %v1550_v52  ;;  %vm237_vm10 = vcmp.eq.s32.totalorder %v189_v56, %v1544_v50 }
  0xbd   : > { %969 = vmatmul.mubr.msk.f32.vlgmr.msra.gmra.mrb[0].mxu0 %vm229_vm2, %v1420_v55  ;;  %1001 = vmatmul.mubr.msk.f32.vlgmr.msra.gmra.mrb[0].mxu1 %vm231_vm3, %v1420_v55  ;;  %vm239_vm11 = vcmp.eq.s32.totalorder %v189_v56, %v1553_v53 }
  0xbe   : > { %v186_v57 = vpop.permute.xlu0 %185  ;;  %v192_v58 = vpop.permute.xlu1 %191 }
  0xbf   : > { %vm234_vm6 = vcmp.eq.s32.totalorder %v186_v57, %v1547_v51  ;;  %vm236_vm7 = vcmp.eq.s32.totalorder %v186_v57, %v1550_v52  ;;  %vm233_vm8 = vcmp.eq.s32.totalorder %v186_v57, %v1544_v50  ;;  %vm235_vm9 = vcmp.eq.s32.totalorder %v186_v57, %v1553_v53 }
  0xc0   : > { %970 = vmatprep.mubr.msk.f32.mxu0 %vm234_vm6, %v1420_v55  ;;  %1002 = vmatprep.mubr.msk.f32.mxu1 %vm236_vm7, %v1420_v55  ;;  %vm242_vm12 = vcmp.eq.s32.totalorder %v192_v58, %v1547_v51  ;;  %vm244_vm13 = vcmp.eq.s32.totalorder %v192_v58, %v1550_v52  ;;  %vm241_vm14 = vcmp.eq.s32.totalorder %v192_v58, %v1544_v50 }
  0xc1   : > { %971 = vmatmul.mubr.msk.f32.gmra.mrb[2].mxu0 %vm233_vm8, %v1420_v55  ;;  %1003 = vmatmul.mubr.msk.f32.gmra.mrb[2].mxu1 %vm235_vm9, %v1420_v55  ;;  %vm243_vm15 = vcmp.eq.s32.totalorder %v192_v58, %v1553_v53 }
  0xc2   : > { %972 = vmatprep.mubr.msk.f32.mxu0 %vm238_vm4, %v1420_v55  ;;  %1004 = vmatprep.mubr.msk.f32.mxu1 %vm240_vm5, %v1420_v55  ;;  %v195_v59 = vpop.permute.xlu0 %194  ;;  %v198_v60 = vpop.permute.xlu1 %197 }
  0xc3   : > { %vm246_vm0 = vcmp.eq.s32.totalorder %v195_v59, %v1547_v51  ;;  %vm248_vm1 = vcmp.eq.s32.totalorder %v195_v59, %v1550_v52  ;;  %vm245_vm2 = vcmp.eq.s32.totalorder %v195_v59, %v1544_v50  ;;  %vm247_vm3 = vcmp.eq.s32.totalorder %v195_v59, %v1553_v53 }
  0xc4   : > { %vm250_vm4 = vcmp.eq.s32.totalorder %v198_v60, %v1547_v51  ;;  %vm252_vm5 = vcmp.eq.s32.totalorder %v198_v60, %v1550_v52  ;;  %vm249_vm6 = vcmp.eq.s32.totalorder %v198_v60, %v1544_v50  ;;  %vm251_vm7 = vcmp.eq.s32.totalorder %v198_v60, %v1553_v53 }
  0xc5   : > { %973 = vmatmul.mubr.msk.f32.gmra.mrb[4].mxu0 %vm237_vm10, %v1420_v55  ;;  %1005 = vmatmul.mubr.msk.f32.gmra.mrb[4].mxu1 %vm239_vm11, %v1420_v55 }
  0xc6   : > { %974 = vmatprep.mubr.msk.f32.mxu0 %vm242_vm12, %v1420_v55  ;;  %1006 = vmatprep.mubr.msk.f32.mxu1 %vm244_vm13, %v1420_v55  ;;  %v201_v61 = vpop.permute.xlu0 %200  ;;  %v204_v62 = vpop.permute.xlu1 %203 }
  0xc7   : > { %vm254_vm8 = vcmp.eq.s32.totalorder %v201_v61, %v1547_v51  ;;  %vm256_vm9 = vcmp.eq.s32.totalorder %v201_v61, %v1550_v52  ;;  %vm253_vm10 = vcmp.eq.s32.totalorder %v201_v61, %v1544_v50  ;;  %vm255_vm11 = vcmp.eq.s32.totalorder %v201_v61, %v1553_v53 }
  0xc8   : > { %vm258_vm12 = vcmp.eq.s32.totalorder %v204_v62, %v1547_v51  ;;  %vm260_vm13 = vcmp.eq.s32.totalorder %v204_v62, %v1550_v52 }
  0xc9   : > { %975 = vmatmul.mubr.msk.f32.gmra.mrb[6].mxu0 %vm241_vm14, %v1420_v55  ;;  %1007 = vmatmul.mubr.msk.f32.gmra.mrb[6].mxu1 %vm243_vm15, %v1420_v55  ;;  %vm257_vm14 = vcmp.eq.s32.totalorder %v204_v62, %v1544_v50  ;;  %vm259_vm15 = vcmp.eq.s32.totalorder %v204_v62, %v1553_v53 }
  0xca   : > { %976 = vmatprep.mubr.msk.f32.mxu0 %vm246_vm0, %v1420_v55  ;;  %1008 = vmatprep.mubr.msk.f32.mxu1 %vm248_vm1, %v1420_v55  ;;  %v207_v63 = vpop.permute.xlu0 %206  ;;  %v210_v0 = vpop.permute.xlu1 %209 }
  0xcb   : > { %vm262_vm0 = vcmp.eq.s32.totalorder %v207_v63, %v1547_v51  ;;  %vm264_vm1 = vcmp.eq.s32.totalorder %v207_v63, %v1550_v52 }
  0xcd   : > { %977 = vmatmul.mubr.msk.f32.gmra.mrb[8].mxu0 %vm245_vm2, %v1420_v55  ;;  %1009 = vmatmul.mubr.msk.f32.gmra.mrb[8].mxu1 %vm247_vm3, %v1420_v55  ;;  %vm261_vm2 = vcmp.eq.s32.totalorder %v207_v63, %v1544_v50  ;;  %vm263_vm3 = vcmp.eq.s32.totalorder %v207_v63, %v1553_v53 }
  0xce   : > { %978 = vmatprep.mubr.msk.f32.mxu0 %vm250_vm4, %v1420_v55  ;;  %1010 = vmatprep.mubr.msk.f32.mxu1 %vm252_vm5, %v1420_v55  ;;  %vm266_vm4 = vcmp.eq.s32.totalorder %v210_v0, %v1547_v51  ;;  %vm268_vm5 = vcmp.eq.s32.totalorder %v210_v0, %v1550_v52  ;;  %v213_v1 = vpop.permute.xlu0 %212  ;;  %v216_v2 = vpop.permute.xlu1 %215 }
  0xd1   : > { %979 = vmatmul.mubr.msk.f32.gmra.mrb[10].mxu0 %vm249_vm6, %v1420_v55  ;;  %1011 = vmatmul.mubr.msk.f32.gmra.mrb[10].mxu1 %vm251_vm7, %v1420_v55  ;;  %vm265_vm6 = vcmp.eq.s32.totalorder %v210_v0, %v1544_v50  ;;  %vm267_vm7 = vcmp.eq.s32.totalorder %v210_v0, %v1553_v53 }
  0xd2   : > { %980 = vmatprep.mubr.msk.f32.mxu0 %vm254_vm8, %v1420_v55  ;;  %1012 = vmatprep.mubr.msk.f32.mxu1 %vm256_vm9, %v1420_v55  ;;  %vm270_vm8 = vcmp.eq.s32.totalorder %v213_v1, %v1547_v51  ;;  %vm272_vm9 = vcmp.eq.s32.totalorder %v213_v1, %v1550_v52  ;;  %v219_v3 = vpop.permute.xlu0 %218  ;;  %v222_v4 = vpop.permute.xlu1 %221 }
  0xd5   : > { %981 = vmatmul.mubr.msk.f32.gmra.mrb[12].mxu0 %vm253_vm10, %v1420_v55  ;;  %1013 = vmatmul.mubr.msk.f32.gmra.mrb[12].mxu1 %vm255_vm11, %v1420_v55  ;;  %vm269_vm10 = vcmp.eq.s32.totalorder %v213_v1, %v1544_v50  ;;  %vm271_vm11 = vcmp.eq.s32.totalorder %v213_v1, %v1553_v53 }
  0xd6   : > { %982 = vmatprep.mubr.msk.f32.mxu0 %vm258_vm12, %v1420_v55  ;;  %1014 = vmatprep.mubr.msk.f32.mxu1 %vm260_vm13, %v1420_v55  ;;  %vm274_vm12 = vcmp.eq.s32.totalorder %v216_v2, %v1547_v51  ;;  %vm276_vm13 = vcmp.eq.s32.totalorder %v216_v2, %v1550_v52  ;;  %v225_v5 = vpop.permute.xlu0 %224  ;;  %v228_v6 = vpop.permute.xlu1 %227 }
  0xd9   : > { %983 = vmatmul.mubr.msk.f32.gmra.mrb[14].mxu0 %vm257_vm14, %v1420_v55  ;;  %1015 = vmatmul.mubr.msk.f32.gmra.mrb[14].mxu1 %vm259_vm15, %v1420_v55  ;;  %vm273_vm14 = vcmp.eq.s32.totalorder %v216_v2, %v1544_v50  ;;  %vm275_vm15 = vcmp.eq.s32.totalorder %v216_v2, %v1553_v53 }
  0xda   : > { %984 = vmatprep.mubr.msk.f32.mxu0 %vm262_vm0, %v1420_v55  ;;  %1016 = vmatprep.mubr.msk.f32.mxu1 %vm264_vm1, %v1420_v55  ;;  %vm278_vm0 = vcmp.eq.s32.totalorder %v219_v3, %v1547_v51  ;;  %vm280_vm1 = vcmp.eq.s32.totalorder %v219_v3, %v1550_v52 }
  0xdd   : > { %985 = vmatmul.mubr.msk.f32.gmra.mrb[16].mxu0 %vm261_vm2, %v1420_v55  ;;  %1017 = vmatmul.mubr.msk.f32.gmra.mrb[16].mxu1 %vm263_vm3, %v1420_v55  ;;  %vm277_vm2 = vcmp.eq.s32.totalorder %v219_v3, %v1544_v50  ;;  %vm279_vm3 = vcmp.eq.s32.totalorder %v219_v3, %v1553_v53 }
  0xde   : > { %986 = vmatprep.mubr.msk.f32.mxu0 %vm266_vm4, %v1420_v55  ;;  %1018 = vmatprep.mubr.msk.f32.mxu1 %vm268_vm5, %v1420_v55  ;;  %vm282_vm4 = vcmp.eq.s32.totalorder %v222_v4, %v1547_v51  ;;  %vm284_vm5 = vcmp.eq.s32.totalorder %v222_v4, %v1550_v52 }
  0xe1   : > { %987 = vmatmul.mubr.msk.f32.gmra.mrb[18].mxu0 %vm265_vm6, %v1420_v55  ;;  %1019 = vmatmul.mubr.msk.f32.gmra.mrb[18].mxu1 %vm267_vm7, %v1420_v55  ;;  %vm281_vm6 = vcmp.eq.s32.totalorder %v222_v4, %v1544_v50  ;;  %vm283_vm7 = vcmp.eq.s32.totalorder %v222_v4, %v1553_v53 }
  0xe2   : > { %988 = vmatprep.mubr.msk.f32.mxu0 %vm270_vm8, %v1420_v55  ;;  %1020 = vmatprep.mubr.msk.f32.mxu1 %vm272_vm9, %v1420_v55  ;;  %vm286_vm8 = vcmp.eq.s32.totalorder %v225_v5, %v1547_v51  ;;  %vm288_vm9 = vcmp.eq.s32.totalorder %v225_v5, %v1550_v52 }
  0xe5   : > { %989 = vmatmul.mubr.msk.f32.gmra.mrb[20].mxu0 %vm269_vm10, %v1420_v55  ;;  %1021 = vmatmul.mubr.msk.f32.gmra.mrb[20].mxu1 %vm271_vm11, %v1420_v55  ;;  %vm285_vm10 = vcmp.eq.s32.totalorder %v225_v5, %v1544_v50  ;;  %vm287_vm11 = vcmp.eq.s32.totalorder %v225_v5, %v1553_v53 }
  0xe6   : > { %990 = vmatprep.mubr.msk.f32.mxu0 %vm274_vm12, %v1420_v55  ;;  %1022 = vmatprep.mubr.msk.f32.mxu1 %vm276_vm13, %v1420_v55  ;;  %vm290_vm12 = vcmp.eq.s32.totalorder %v228_v6, %v1547_v51  ;;  %vm292_vm13 = vcmp.eq.s32.totalorder %v228_v6, %v1550_v52 }
  0xe9   : > { %991 = vmatmul.mubr.msk.f32.gmra.mrb[22].mxu0 %vm273_vm14, %v1420_v55  ;;  %1023 = vmatmul.mubr.msk.f32.gmra.mrb[22].mxu1 %vm275_vm15, %v1420_v55  ;;  %vm289_vm14 = vcmp.eq.s32.totalorder %v228_v6, %v1544_v50  ;;  %vm291_vm15 = vcmp.eq.s32.totalorder %v228_v6, %v1553_v53 }
  0xea   : > { %992 = vmatprep.mubr.msk.f32.mxu0 %vm278_vm0, %v1420_v55  ;;  %1024 = vmatprep.mubr.msk.f32.mxu1 %vm280_vm1, %v1420_v55 }
  0xed   : > { %993 = vmatmul.mubr.msk.f32.gmra.mrb[24].mxu0 %vm277_vm2, %v1420_v55  ;;  %1025 = vmatmul.mubr.msk.f32.gmra.mrb[24].mxu1 %vm279_vm3, %v1420_v55 }
  0xee   : > { %994 = vmatprep.mubr.msk.f32.mxu0 %vm282_vm4, %v1420_v55  ;;  %1026 = vmatprep.mubr.msk.f32.mxu1 %vm284_vm5, %v1420_v55 }
  0xf1   : > { %995 = vmatmul.mubr.msk.f32.gmra.mrb[26].mxu0 %vm281_vm6, %v1420_v55  ;;  %1027 = vmatmul.mubr.msk.f32.gmra.mrb[26].mxu1 %vm283_vm7, %v1420_v55 }
  0xf2   : > { %996 = vmatprep.mubr.msk.f32.mxu0 %vm286_vm8, %v1420_v55  ;;  %1028 = vmatprep.mubr.msk.f32.mxu1 %vm288_vm9, %v1420_v55 }
  0xf5   : > { %997 = vmatmul.mubr.msk.f32.gmra.mrb[28].mxu0 %vm285_vm10, %v1420_v55  ;;  %1029 = vmatmul.mubr.msk.f32.gmra.mrb[28].mxu1 %vm287_vm11, %v1420_v55 }
  0xf6   : > { %998 = vmatprep.mubr.msk.f32.mxu0 %vm290_vm12, %v1420_v55  ;;  %1030 = vmatprep.mubr.msk.f32.mxu1 %vm292_vm13, %v1420_v55 }
  0xf9   : > { %999 = vmatmul.mubr.msk.f32.gmra.mrb[30].mxu0 %vm289_vm14, %v1420_v55  ;;  %1031 = vmatmul.mubr.msk.f32.gmra.mrb[30].mxu1 %vm291_vm15, %v1420_v55 }
 0x190   : > { %v1070_v7 = vpop.f32.mrb[0].mxu0  ;;  %v1150_v8 = vpop.f32.mrb[0].mxu1 }
 0x191   : > { %v1071_v9 = vpop.f32.mrb[1].mxu0  ;;  %v1151_v10 = vpop.f32.mrb[1].mxu1 }
 0x192   : > { %v1072_v11 = vadd.f32 %v1071_v9, %v1070_v7  ;;  %v1152_v12 = vadd.f32 %v1151_v10, %v1150_v8 }
 0x194   : > { %v697_v13 = vadd.f32 %v1152_v12, %v1072_v11  ;;  %v1073_v14 = vpop.f32.mrb[2].mxu0  ;;  %v1153_v15 = vpop.f32.mrb[2].mxu1 }
 0x195   : > { %v1074_v16 = vpop.f32.mrb[3].mxu0  ;;  %v1154_v17 = vpop.f32.mrb[3].mxu1 }
 0x196   : > { %v775_v18 = vmul.f32 11.313708, %v697_v13  ;;  %v1075_v19 = vadd.f32 %v1074_v16, %v1073_v14  ;;  %v1155_v20 = vadd.f32 %v1154_v17, %v1153_v15 }
 0x198   : > { %791 = vst [vmem:[%s1686_s25] sm:$0xff] %v775_v18  ;;  %v702_v21 = vadd.f32 %v1155_v20, %v1075_v19  ;;  %v1076_v22 = vpop.f32.mrb[4].mxu0  ;;  %v1156_v23 = vpop.f32.mrb[4].mxu1 }
 0x199   : > { %v1077_v24 = vpop.f32.mrb[5].mxu0  ;;  %v1157_v25 = vpop.f32.mrb[5].mxu1 }
 0x19a   : > { %v776_v26 = vmul.f32 11.313708, %v702_v21  ;;  %v1078_v27 = vadd.f32 %v1077_v24, %v1076_v22  ;;  %v1158_v28 = vadd.f32 %v1157_v25, %v1156_v23 }
 0x19c   : > { %792 = vst [vmem:[%s1686_s25 + $0x8] sm:$0xff] %v776_v26  ;;  %v707_v29 = vadd.f32 %v1158_v28, %v1078_v27  ;;  %v1079_v30 = vpop.f32.mrb[6].mxu0  ;;  %v1159_v31 = vpop.f32.mrb[6].mxu1 }
 0x19d   : > { %v1080_v32 = vpop.f32.mrb[7].mxu0  ;;  %v1160_v33 = vpop.f32.mrb[7].mxu1 }
 0x19e   : > { %v777_v34 = vmul.f32 11.313708, %v707_v29  ;;  %v1081_v35 = vadd.f32 %v1080_v32, %v1079_v30  ;;  %v1161_v36 = vadd.f32 %v1160_v33, %v1159_v31 }
 0x1a0   : > { %793 = vst [vmem:[%s1686_s25 + $0x10] sm:$0xff] %v777_v34  ;;  %v712_v37 = vadd.f32 %v1161_v36, %v1081_v35  ;;  %v1082_v38 = vpop.f32.mrb[8].mxu0  ;;  %v1162_v39 = vpop.f32.mrb[8].mxu1 }
 0x1a1   : > { %v1083_v40 = vpop.f32.mrb[9].mxu0  ;;  %v1163_v41 = vpop.f32.mrb[9].mxu1 }
 0x1a2   : > { %v778_v42 = vmul.f32 11.313708, %v712_v37  ;;  %v1084_v43 = vadd.f32 %v1083_v40, %v1082_v38  ;;  %v1164_v44 = vadd.f32 %v1163_v41, %v1162_v39 }
 0x1a4   : > { %794 = vst [vmem:[%s1686_s25 + $0x18] sm:$0xff] %v778_v42  ;;  %v717_v45 = vadd.f32 %v1164_v44, %v1084_v43  ;;  %v1085_v46 = vpop.f32.mrb[10].mxu0  ;;  %v1165_v47 = vpop.f32.mrb[10].mxu1 }
 0x1a5   : > { %v1086_v48 = vpop.f32.mrb[11].mxu0  ;;  %v1166_v49 = vpop.f32.mrb[11].mxu1 }
 0x1a6   : > { %v779_v50 = vmul.f32 11.313708, %v717_v45  ;;  %v1087_v51 = vadd.f32 %v1086_v48, %v1085_v46  ;;  %v1167_v52 = vadd.f32 %v1166_v49, %v1165_v47 }
 0x1a8   : > { %795 = vst [vmem:[%s1686_s25 + $0x20] sm:$0xff] %v779_v50  ;;  %v722_v53 = vadd.f32 %v1167_v52, %v1087_v51  ;;  %v1088_v54 = vpop.f32.mrb[12].mxu0  ;;  %v1168_v55 = vpop.f32.mrb[12].mxu1 }
 0x1a9   : > { %v1089_v56 = vpop.f32.mrb[13].mxu0  ;;  %v1169_v57 = vpop.f32.mrb[13].mxu1 }
 0x1aa   : > { %v780_v58 = vmul.f32 11.313708, %v722_v53  ;;  %v1090_v59 = vadd.f32 %v1089_v56, %v1088_v54  ;;  %v1170_v60 = vadd.f32 %v1169_v57, %v1168_v55 }
 0x1ac   : > { %796 = vst [vmem:[%s1686_s25 + $0x28] sm:$0xff] %v780_v58  ;;  %v727_v61 = vadd.f32 %v1170_v60, %v1090_v59  ;;  %v1091_v62 = vpop.f32.mrb[14].mxu0  ;;  %v1171_v63 = vpop.f32.mrb[14].mxu1 }
 0x1ad   : > { %v1092_v0 = vpop.f32.mrb[15].mxu0  ;;  %v1172_v1 = vpop.f32.mrb[15].mxu1 }
 0x1ae   : > { %v781_v2 = vmul.f32 11.313708, %v727_v61  ;;  %v1093_v3 = vadd.f32 %v1092_v0, %v1091_v62  ;;  %v1173_v4 = vadd.f32 %v1172_v1, %v1171_v63 }
 0x1b0   : > { %797 = vst [vmem:[%s1686_s25 + $0x30] sm:$0xff] %v781_v2  ;;  %v732_v5 = vadd.f32 %v1173_v4, %v1093_v3  ;;  %v1094_v6 = vpop.f32.mrb[16].mxu0  ;;  %v1174_v7 = vpop.f32.mrb[16].mxu1 }
 0x1b1   : > { %v1095_v8 = vpop.f32.mrb[17].mxu0  ;;  %v1175_v9 = vpop.f32.mrb[17].mxu1 }
 0x1b2   : > { %v782_v10 = vmul.f32 11.313708, %v732_v5  ;;  %v1096_v11 = vadd.f32 %v1095_v8, %v1094_v6  ;;  %v1176_v12 = vadd.f32 %v1175_v9, %v1174_v7 }
 0x1b4   : > { %798 = vst [vmem:[%s1686_s25 + $0x38] sm:$0xff] %v782_v10  ;;  %v737_v13 = vadd.f32 %v1176_v12, %v1096_v11  ;;  %v1097_v14 = vpop.f32.mrb[18].mxu0  ;;  %v1177_v15 = vpop.f32.mrb[18].mxu1 }
 0x1b5   : > { %v1098_v16 = vpop.f32.mrb[19].mxu0  ;;  %v1178_v17 = vpop.f32.mrb[19].mxu1 }
 0x1b6   : > { %v783_v18 = vmul.f32 11.313708, %v737_v13  ;;  %v1099_v19 = vadd.f32 %v1098_v16, %v1097_v14  ;;  %v1179_v20 = vadd.f32 %v1178_v17, %v1177_v15 }
 0x1b8   : > { %799 = vst [vmem:[%s1686_s25 + $0x40] sm:$0xff] %v783_v18  ;;  %v742_v21 = vadd.f32 %v1179_v20, %v1099_v19  ;;  %v1100_v22 = vpop.f32.mrb[20].mxu0  ;;  %v1180_v23 = vpop.f32.mrb[20].mxu1 }
 0x1b9   : > { %v1101_v24 = vpop.f32.mrb[21].mxu0  ;;  %v1181_v25 = vpop.f32.mrb[21].mxu1 }
 0x1ba   : > { %v784_v26 = vmul.f32 11.313708, %v742_v21  ;;  %v1102_v27 = vadd.f32 %v1101_v24, %v1100_v22  ;;  %v1182_v28 = vadd.f32 %v1181_v25, %v1180_v23 }
 0x1bc   : > { %800 = vst [vmem:[%s1686_s25 + $0x48] sm:$0xff] %v784_v26  ;;  %v747_v29 = vadd.f32 %v1182_v28, %v1102_v27  ;;  %v1103_v30 = vpop.f32.mrb[22].mxu0  ;;  %v1183_v31 = vpop.f32.mrb[22].mxu1 }
 0x1bd   : > { %v1104_v32 = vpop.f32.mrb[23].mxu0  ;;  %v1184_v33 = vpop.f32.mrb[23].mxu1 }
 0x1be   : > { %v785_v34 = vmul.f32 11.313708, %v747_v29  ;;  %v1105_v35 = vadd.f32 %v1104_v32, %v1103_v30  ;;  %v1185_v36 = vadd.f32 %v1184_v33, %v1183_v31 }
 0x1c0   : > { %801 = vst [vmem:[%s1686_s25 + $0x50] sm:$0xff] %v785_v34  ;;  %v752_v37 = vadd.f32 %v1185_v36, %v1105_v35  ;;  %v1106_v38 = vpop.f32.mrb[24].mxu0  ;;  %v1186_v39 = vpop.f32.mrb[24].mxu1 }
 0x1c1   : > { %v1107_v40 = vpop.f32.mrb[25].mxu0  ;;  %v1187_v41 = vpop.f32.mrb[25].mxu1 }
 0x1c2   : > { %v786_v42 = vmul.f32 11.313708, %v752_v37  ;;  %v1108_v43 = vadd.f32 %v1107_v40, %v1106_v38  ;;  %v1188_v44 = vadd.f32 %v1187_v41, %v1186_v39 }
 0x1c4   : > { %802 = vst [vmem:[%s1686_s25 + $0x58] sm:$0xff] %v786_v42  ;;  %v757_v45 = vadd.f32 %v1188_v44, %v1108_v43  ;;  %v1109_v46 = vpop.f32.mrb[26].mxu0  ;;  %v1189_v47 = vpop.f32.mrb[26].mxu1 }
 0x1c5   : > { %v1110_v48 = vpop.f32.mrb[27].mxu0  ;;  %v1190_v49 = vpop.f32.mrb[27].mxu1 }
 0x1c6   : > { %v787_v50 = vmul.f32 11.313708, %v757_v45  ;;  %v1111_v51 = vadd.f32 %v1110_v48, %v1109_v46  ;;  %v1191_v52 = vadd.f32 %v1190_v49, %v1189_v47 }
 0x1c8   : > { %803 = vst [vmem:[%s1686_s25 + $0x60] sm:$0xff] %v787_v50  ;;  %v762_v53 = vadd.f32 %v1191_v52, %v1111_v51  ;;  %v1112_v54 = vpop.f32.mrb[28].mxu0  ;;  %v1192_v55 = vpop.f32.mrb[28].mxu1 }
 0x1c9   : > { %v1113_v56 = vpop.f32.mrb[29].mxu0  ;;  %v1193_v57 = vpop.f32.mrb[29].mxu1 }
 0x1ca   : > { %v788_v58 = vmul.f32 11.313708, %v762_v53  ;;  %v1114_v59 = vadd.f32 %v1113_v56, %v1112_v54  ;;  %v1194_v60 = vadd.f32 %v1193_v57, %v1192_v55 }
 0x1cc   : > { %804 = vst [vmem:[%s1686_s25 + $0x68] sm:$0xff] %v788_v58  ;;  %v767_v61 = vadd.f32 %v1194_v60, %v1114_v59  ;;  %v1115_v62 = vpop.f32.mrb[30].mxu0  ;;  %v1195_v63 = vpop.f32.mrb[30].mxu1 }
 0x1cd   : > { %v1116_v0 = vpop.f32.mrb[31].mxu0  ;;  %v1196_v1 = vpop.f32.mrb[31].mxu1 }
 0x1ce   : > { %v789_v2 = vmul.f32 11.313708, %v767_v61  ;;  %v1117_v3 = vadd.f32 %v1116_v0, %v1115_v62  ;;  %v1197_v4 = vadd.f32 %v1196_v1, %v1195_v63 }
 0x1d0   : > { %805 = vst [vmem:[%s1686_s25 + $0x70] sm:$0xff] %v789_v2  ;;  %v772_v5 = vadd.f32 %v1197_v4, %v1117_v3 }
 0x1d2   : > { %v790_v6 = vmul.f32 11.313708, %v772_v5 }
 0x1d4   : > { %806 = vst [vmem:[%s1686_s25 + $0x78] sm:$0xff] %v790_v6 }
 0x1d5   : > { %1361 = shalt.err (!%p1358_p7)
}
 0x1d6   : > { %s1362_s7 = scalar_lea.hbm %s1708_s30, 2048  ;;  %s1366_s16 = scalar_lea.hbm %s1758_s2, 4096 }
 0x1d7   : > { %p1363_p8 = scmp.ne.s32.totalorder %s1708_s30, %s1362_s7  ;;  %p1367_p1 = scmp.lt.u32.totalorder %s1708_s30, %s1758_s2 }
 0x1d8   : > { %p1368_p0 = scmp.lt.u32.totalorder %s1366_s16, %s1362_s7  ;;  %p1370_p6 = scmp.lt.u32.totalorder %s1362_s7, %s1708_s30 }
 0x1d9   : > { %p1364_p11 = pnand %p1363_p8, %p1769_p9 }
 0x1da   : > { %p1369_p5 = por %p1368_p0, %p1367_p1 }
 0x1db   : > { %p1365_p13 = pneg %p1364_p11 }
 0x1dc   : > { %p1371_p10 = por %p1370_p6, %p1369_p5 }
 0x1de   : > { %p1372_p12 = pnand %p1371_p10, %p1365_p13 }
 0x1e0   : > { %1375 = shalt.err (!%p1372_p12)
}
 0x1e1   : > { %s1422_s23 = smov 128   ;;  %s1423_s21 = smov 8  }
 0x1e2   : > { %1266 = dma.vmem_to_hbm [thread:$0]  (%p1769_p9), %s1710_s27, 2048, %s1708_s30, %s1715_s3, %s1422_s23, %s1422_s23, %s1423_s21  }
 0x1e3 PF: > { %p1278_p2 = scmp.ge.s32.totalorder %s1414_s12, 2  ;;  %s836_s24 = sand.u32 1, %s1402_s9  }
 0x1e4   : > { %p1770_p3 = scmp.ne.s32.totalorder %s1763_s20, 0  ;;  %s837_s25 = scalar_lea.sflag [#allocation4], %s836_s24 }
 0x1e6   : > { %p1273_p4 = pnand %p1278_p2, %p1770_p3 }
 0x1e8   : > { %1397 = dma.done.wait (!%p1273_p4), %s837_s25, 2048  }
 0x1e9   : > { %1399 = vsyncadd (!%p1273_p4), %s837_s25, 4294965248  ;;  %p13_p7 = scmp.ge.s32.totalorder %s1464_s15, 4   ;;  %s1771_s9 = smov %s1406_s10 }
 0x1ea   : > { %s1772_s10 = smov %s1410_s11  ;;  %s1773_s11 = smov %s1475_s18 }
 0x1eb   : > { %s1774_s12 = smov %s1464_s15  ;;  %15 = sbr.rel (!%p13_p7) target bundleno = 4 (0x4), region = 68 }
 0x1f2   :  { %842 = vsyncpa [#allocation3], 1 }
 0x1f3   :  { %844 = vsyncpa [#allocation3 + $0x1], 1 }
 0x1f4   :  { %845 = vsyncpa [#allocation4], 1 }
 0x1f5   :  { %847 = vsyncpa [#allocation4 + $0x1], 1 }

</bundles_post_ra>
